<compile_context>
chip_gen: v6e
topology: v6e:2x2x1
jax: 0.10.0
libtpu: 0.0.40
codegen_flags: <defaults>
</compile_context>

<pallas_src>
import functools

import jax
import jax.numpy as jnp
from jax.experimental import pallas as pl
from jax.experimental.pallas import tpu as pltpu


def _round_up(n: int, m: int) -> int:
    return (n + m - 1) // m * m


def mlp_kernel(x_ref, w1_ref, b1_ref, w2_ref, b2_ref, o_ref):
    # fc1: x @ W1 (bf16 operands, f32 accumulate on the MXU), bias in f32.
    h = jnp.dot(x_ref[...], w1_ref[...], preferred_element_type=jnp.float32)
    h = jnp.maximum(h + b1_ref[...], 0.0)          # ReLU; b1 is (1, H_pad) f32
    # fc2: cast hidden back to bf16 for the MXU, accumulate in f32.
    y = jnp.dot(h.astype(w2_ref.dtype), w2_ref[...],
                preferred_element_type=jnp.float32)
    o_ref[...] = (y + b2_ref[...]).astype(o_ref.dtype)


@functools.partial(jax.jit, static_argnames=("tm_max",))
def new_model_forward(x, w1, b1, w2, b2, *, tm_max: int = 128):
    """Forward pass of NewModel.

    x:  (B, input_size)  float32
    w1: (input_size, hidden)   b1: (hidden,) or (1, hidden)
    w2: (hidden, output)       b2: (output,) or (1, output)
    Returns (B, output) float32.
    """
    compute_dtype = jnp.bfloat16
    B, K = x.shape
    H = w1.shape[1]
    N = w2.shape[1]

    # Lane-align all feature dims to 128; sublane-align / block the batch.
    K_pad = _round_up(K, 128)
    H_pad = _round_up(H, 128)
    N_pad = _round_up(N, 128)
    TM = min(tm_max, _round_up(B, 8))
    B_pad = _round_up(B, TM)

    xp = jnp.zeros((B_pad, K_pad), compute_dtype).at[:B, :K].set(
        x.astype(compute_dtype))
    w1p = jnp.zeros((K_pad, H_pad), compute_dtype).at[:K, :H].set(
        w1.astype(compute_dtype))
    b1p = jnp.zeros((1, H_pad), jnp.float32).at[:, :H].set(
        b1.astype(jnp.float32).reshape(1, H))
    w2p = jnp.zeros((H_pad, N_pad), compute_dtype).at[:H, :N].set(
        w2.astype(compute_dtype))
    b2p = jnp.zeros((1, N_pad), jnp.float32).at[:, :N].set(
        b2.astype(jnp.float32).reshape(1, N))

    grid = (B_pad // TM,)
    out_padded = pl.pallas_call(
        mlp_kernel,
        out_shape=jax.ShapeDtypeStruct((B_pad, N_pad), jnp.float32),
        grid_spec=pl.GridSpec(
            grid=grid,
            in_specs=[
                # x tile marches over the batch; weights/biases stay resident.
                pl.BlockSpec((TM, K_pad), lambda i: (i, 0)),
                pl.BlockSpec((K_pad, H_pad), lambda i: (0, 0)),
                pl.BlockSpec((1, H_pad), lambda i: (0, 0)),
                pl.BlockSpec((H_pad, N_pad), lambda i: (0, 0)),
                pl.BlockSpec((1, N_pad), lambda i: (0, 0)),
            ],
            out_specs=pl.BlockSpec((TM, N_pad), lambda i: (i, 0)),
        ),
        compiler_params=pltpu.CompilerParams(
            # Batch blocks are independent -> shard across both TCs on v7x.
            dimension_semantics=("parallel",),
            vmem_limit_bytes=64 * 1024 * 1024,
        ),
    )(xp, w1p, b1p, w2p, b2p)

    # Strip batch / lane padding.
    return out_padded[:B, :N]


def init_params(key, input_size, hidden_size, output_size, dtype=jnp.float32):
    """Deterministic init mimicking nn.Linear's uniform(-1/sqrt(fan_in), ...)."""
    k1, k2, k3, k4 = jax.random.split(key, 4)
    bound1 = 1.0 / (input_size ** 0.5)
    bound2 = 1.0 / (hidden_size ** 0.5)
    # Stored pre-transposed: (in_features, out_features)
    w1 = jax.random.uniform(k1, (input_size, hidden_size), dtype,
                            minval=-bound1, maxval=bound1)
    b1 = jax.random.uniform(k2, (1, hidden_size), dtype,
                            minval=-bound1, maxval=bound1)
    w2 = jax.random.uniform(k3, (hidden_size, output_size), dtype,
                            minval=-bound2, maxval=bound2)
    b2 = jax.random.uniform(k4, (1, output_size), dtype,
                            minval=-bound2, maxval=bound2)
    return w1, b1, w2, b2


if __name__ == "__main__":
    key = jax.random.PRNGKey(0)
    batch, input_size, hidden_size, output_size = 8, 32, 64, 16

    kx, kp = jax.random.split(key)
    x = jax.random.normal(kx, (batch, input_size), jnp.float32)
    w1, b1, w2, b2 = init_params(kp, input_size, hidden_size, output_size)

    out = new_model_forward(x, w1, b1, w2, b2)
    jax.block_until_ready(out)
    assert out.shape == (batch, output_size)

    # Pure-JAX f32 reference (same semantics as the PyTorch module).
    ref_f32 = jnp.maximum(x @ w1 + b1, 0.0) @ w2 + b2
    # bf16-matched reference (mirrors the kernel's compute dtype path).
    bf = jnp.bfloat16
    h_bf = jnp.maximum(
        jnp.dot(x.astype(bf), w1.astype(bf),
                preferred_element_type=jnp.float32) + b1, 0.0)
    ref_bf16 = jnp.dot(h_bf.astype(bf), w2.astype(bf),
                       preferred_element_type=jnp.float32) + b2

    assert jnp.allclose(out, ref_bf16, atol=1e-3, rtol=1e-3), "bf16-path mismatch"
    assert jnp.allclose(out, ref_f32, atol=3e-2, rtol=3e-2), "f32 ref mismatch"

    print("KERNEL_OK")
</pallas_src>

<mosaic_0001>
module attributes {stable_mosaic.version = 11 : i64} {
  func.func @mlp_kernel(%arg0: i32, %arg1: memref<8x128xbf16, #tpu.memory_space<vmem>>, %arg2: memref<128x128xbf16, #tpu.memory_space<vmem>>, %arg3: memref<1x128xf32, #tpu.memory_space<vmem>>, %arg4: memref<128x128xbf16, #tpu.memory_space<vmem>>, %arg5: memref<1x128xf32, #tpu.memory_space<vmem>>, %arg6: memref<8x128xf32, #tpu.memory_space<vmem>>) attributes {dimension_semantics = [#tpu.dimension_semantics<parallel>], iteration_bounds = array<i64: 1>, scalar_prefetch = 0 : i64, scratch_operands = 0 : i64, tpu.core_type = #tpu.core_type<tc>, window_params = [{transform_indices = @transform_0, window_bounds = array<i64: 8, 128>}, {pipeline_mode = #tpu.pipeline_mode<synchronous>, transform_indices = @transform_1, window_bounds = array<i64: 128, 128>}, {pipeline_mode = #tpu.pipeline_mode<synchronous>, transform_indices = @transform_2, window_bounds = array<i64: 1, 128>}, {pipeline_mode = #tpu.pipeline_mode<synchronous>, transform_indices = @transform_3, window_bounds = array<i64: 128, 128>}, {pipeline_mode = #tpu.pipeline_mode<synchronous>, transform_indices = @transform_4, window_bounds = array<i64: 1, 128>}, {transform_indices = @transform_5, window_bounds = array<i64: 8, 128>}]} {
    %c0 = arith.constant 0 : index
    %c0_0 = arith.constant 0 : index
    %0 = vector.load %arg1[%c0, %c0_0] : memref<8x128xbf16, #tpu.memory_space<vmem>>, vector<8x128xbf16>
    %c0_1 = arith.constant 0 : index
    %c0_2 = arith.constant 0 : index
    %1 = vector.load %arg2[%c0_1, %c0_2] : memref<128x128xbf16, #tpu.memory_space<vmem>>, vector<128x128xbf16>
    %cst = arith.constant dense<0.000000e+00> : vector<8x128xf32>
    %2 = tpu.matmul %0, %1, %cst {dimension_numbers = #tpu.dot_dimension_numbers<[1], [0], [0], [1], [0, 0, 1, 1], [], []>} : vector<8x128xbf16>, vector<128x128xbf16>, vector<8x128xf32> -> vector<8x128xf32>
    %c0_3 = arith.constant 0 : index
    %c0_4 = arith.constant 0 : index
    %3 = vector.load %arg3[%c0_3, %c0_4] : memref<1x128xf32, #tpu.memory_space<vmem>>, vector<1x128xf32>
    %4 = vector.broadcast %3 : vector<1x128xf32> to vector<8x128xf32>
    %5 = arith.addf %2, %4 : vector<8x128xf32>
    %cst_5 = arith.constant 0.000000e+00 : f32
    %6 = vector.broadcast %cst_5 : f32 to vector<8x128xf32>
    %7 = arith.maximumf %5, %6 : vector<8x128xf32>
    %8 = arith.truncf %7 : vector<8x128xf32> to vector<8x128xbf16>
    %c0_6 = arith.constant 0 : index
    %c0_7 = arith.constant 0 : index
    %9 = vector.load %arg4[%c0_6, %c0_7] : memref<128x128xbf16, #tpu.memory_space<vmem>>, vector<128x128xbf16>
    %cst_8 = arith.constant dense<0.000000e+00> : vector<8x128xf32>
    %10 = tpu.matmul %8, %9, %cst_8 {dimension_numbers = #tpu.dot_dimension_numbers<[1], [0], [0], [1], [0, 0, 1, 1], [], []>} : vector<8x128xbf16>, vector<128x128xbf16>, vector<8x128xf32> -> vector<8x128xf32>
    %c0_9 = arith.constant 0 : index
    %c0_10 = arith.constant 0 : index
    %11 = vector.load %arg5[%c0_9, %c0_10] : memref<1x128xf32, #tpu.memory_space<vmem>>, vector<1x128xf32>
    %12 = vector.broadcast %11 : vector<1x128xf32> to vector<8x128xf32>
    %13 = arith.addf %10, %12 : vector<8x128xf32>
    %c0_11 = arith.constant 0 : index
    %c0_12 = arith.constant 0 : index
    %14 = vector.load %arg6[%c0_11, %c0_12] : memref<8x128xf32, #tpu.memory_space<vmem>>, vector<8x128xf32>
    tpu.vector_store %arg6[%c0_11, %c0_12], %13 {strides = array<i32>} : memref<8x128xf32, #tpu.memory_space<vmem>>, vector<8x128xf32>,
    return
  }
  func.func @transform_0(%arg0: i32) -> (i32, i32) {
    %c0_i32 = arith.constant 0 : i32
    %c0_i32_0 = arith.constant 0 : i32
    return %arg0, %c0_i32 : i32, i32
  }
  func.func @transform_1(%arg0: i32) -> (i32, i32) {
    %c0_i32 = arith.constant 0 : i32
    %c0_i32_0 = arith.constant 0 : i32
    %c0_i32_1 = arith.constant 0 : i32
    return %c0_i32, %c0_i32_0 : i32, i32
  }
  func.func @transform_2(%arg0: i32) -> (i32, i32) {
    %c0_i32 = arith.constant 0 : i32
    %c0_i32_0 = arith.constant 0 : i32
    %c0_i32_1 = arith.constant 0 : i32
    return %c0_i32, %c0_i32_0 : i32, i32
  }
  func.func @transform_3(%arg0: i32) -> (i32, i32) {
    %c0_i32 = arith.constant 0 : i32
    %c0_i32_0 = arith.constant 0 : i32
    %c0_i32_1 = arith.constant 0 : i32
    return %c0_i32, %c0_i32_0 : i32, i32
  }
  func.func @transform_4(%arg0: i32) -> (i32, i32) {
    %c0_i32 = arith.constant 0 : i32
    %c0_i32_0 = arith.constant 0 : i32
    %c0_i32_1 = arith.constant 0 : i32
    return %c0_i32, %c0_i32_0 : i32, i32
  }
  func.func @transform_5(%arg0: i32) -> (i32, i32) {
    %c0_i32 = arith.constant 0 : i32
    %c0_i32_0 = arith.constant 0 : i32
    return %arg0, %c0_i32 : i32, i32
  }
}

</mosaic_0001>

<bundles_post_ra>
// kernel: new_model_forward.1
= control target key start
LH: loop header
LB: loop body
LE: loop exit
PB: predicated region body
PF: predicated region fallthrough
CT: control target
= control target key end

     0   :  { %v379_v1 = vmov 0.0   ;;  %vm380_vm0 = vmmov 0   ;;  %s472_s0 = inlined_call_operand.vmem [shape: bf16[8,128], index: 0, kind: input, shape index: {}]   ;;  %s473_s1 = inlined_call_operand.vmem [shape: bf16[128,128], index: 1, kind: input, shape index: {}]   ;;  %s474_s2 = inlined_call_operand.vmem [shape: f32[1,128], index: 2, kind: input, shape index: {}]   ;;  %s475_s3 = inlined_call_operand.vmem [shape: bf16[128,128], index: 3, kind: input, shape index: {}]   ;;  %s476_s4 = inlined_call_operand.vmem [shape: f32[1,128], index: 4, kind: input, shape index: {}]   ;;  %s477_s5 = inlined_call_operand.hbm [shape: f32[8,128], index: 5, kind: output, shape index: {}]  }
   0x1   :  { %v341_v0 = vld [vmem:[%s473_s1 + $0x38] sm:$0xff]   ;;  %298 = vmatprep.subr.bf16.mxu0 %v379_v1  ;;  %318 = vmatprep.subr.bf16.mxu1 %v379_v1  ;;  %v342_v2 = vld [vmem:[%s473_s1 + $0x30] sm:$0xff]   ;;  %v343_v3 = vld [vmem:[%s473_s1 + $0x28] sm:$0xff]  }
   0x2   :  { %299 = vmatpush3.bf16.msra.mxu0 %v341_v0  ;;  %314 = vmatprep.mubr.msk.bf16.mxu0 %vm380_vm0, %v379_v1  ;;  %v349_v4 = vld [vmem:[%s475_s3 + $0x38] sm:$0xff]   ;;  %v344_v5 = vld [vmem:[%s473_s1 + $0x20] sm:$0xff]   ;;  %v350_v6 = vld [vmem:[%s475_s3 + $0x30] sm:$0xff]  }
   0x3   :  { %300 = vmatprep.subr.bf16.mxu0 %v379_v1  ;;  %334 = vmatprep.mubr.msk.bf16.mxu1 %vm380_vm0, %v379_v1  ;;  %v345_v7 = vld [vmem:[%s473_s1 + $0x18] sm:$0xff]   ;;  %v351_v8 = vld [vmem:[%s475_s3 + $0x28] sm:$0xff]  }
   0x4   :  { %319 = vmatpush3.bf16.msra.mxu1 %v349_v4 }
   0x5   :  { %320 = vmatprep.subr.bf16.mxu1 %v379_v1 }
   0x6   :  { %301 = vmatpush3.bf16.msra.mxu0 %v342_v2 }
   0x7   :  { %302 = vmatprep.subr.bf16.mxu0 %v379_v1 }
   0x8   :  { %321 = vmatpush3.bf16.msra.mxu1 %v350_v6 }
   0x9   :  { %322 = vmatprep.subr.bf16.mxu1 %v379_v1 }
   0xa   :  { %303 = vmatpush3.bf16.msra.mxu0 %v343_v3 }
   0xb   :  { %304 = vmatprep.subr.bf16.mxu0 %v379_v1 }
   0xe   :  { %305 = vmatpush3.bf16.msra.mxu0 %v344_v5 }
   0xf   :  { %306 = vmatprep.subr.bf16.mxu0 %v379_v1 }
  0x10   :  { %10 = vsyncpa [#allocation3], 0  ;;  %v346_v9 = vld [vmem:[%s473_s1 + $0x10] sm:$0xff]   ;;  %323 = vmatpush3.bf16.msra.mxu1 %v351_v8  ;;  %v352_v10 = vld [vmem:[%s475_s3 + $0x20] sm:$0xff]   ;;  %s381_s29 = smov [#allocation2]  }
  0x11   :  { %324 = vmatprep.subr.bf16.mxu1 %v379_v1  ;;  %v347_v11 = vld [vmem:[%s473_s1 + $0x8] sm:$0xff]   ;;  %v353_v12 = vld [vmem:[%s475_s3 + $0x18] sm:$0xff]   ;;  %v348_v13 = vld [vmem:[%s473_s1] sm:$0xff]   ;;  %s254_s30 = sshll.u32 %s381_s29, 4  ;;  %s255_s30 = int_to_ptr.vmem [resolvable:$true] %s254_s30 }
  0x12   :  { %307 = vmatpush3.bf16.msra.mxu0 %v345_v7  ;;  %v354_v14 = vld [vmem:[%s475_s3 + $0x10] sm:$0xff]   ;;  %v22_v15 = vld [vmem:[%s472_s0] sm:$0xf]  ;;  %v355_v16 = vld [vmem:[%s475_s3 + $0x8] sm:$0xff]   ;;  %p362_p1 = scmp.lt.s32.totalorder %s255_s30, %s255_s30 }
  0x13   :  { %308 = vmatprep.subr.bf16.mxu0 %v379_v1  ;;  %v356_v17 = vld [vmem:[%s475_s3] sm:$0xff]  }
  0x14   :  { %325 = vmatpush3.bf16.msra.mxu1 %v352_v10  ;;  %v262_v18 = vld [vmem:[%s474_s2] ss:$0 sm:$0xff]  ;;  %s357_s2 = scalar_lea.vmem %s255_s30, 128 }
  0x15   :  { %326 = vmatprep.subr.bf16.mxu1 %v379_v1  ;;  %v271_v26 = vld [vmem:[%s476_s4] ss:$0 sm:$0xff]  ;;  %p358_p0 = scmp.ne.s32.totalorder %s255_s30, %s357_s2  ;;  %p363_p2 = scmp.lt.s32.totalorder %s357_s2, %s357_s2 }
  0x16   :  { %309 = vmatpush3.bf16.msra.mxu0 %v346_v9 }
  0x17   :  { %310 = vmatprep.subr.bf16.mxu0 %v379_v1  ;;  %p364_p3 = por %p363_p2, %p362_p1 }
  0x18   :  { %327 = vmatpush3.bf16.msra.mxu1 %v353_v12 }
  0x19   :  { %328 = vmatprep.subr.bf16.mxu1 %v379_v1  ;;  %p365_p4 = pnand %p364_p3, %p358_p0 }
  0x1a   :  { %311 = vmatpush3.bf16.msra.mxu0 %v347_v11 }
  0x1b   :  { %312 = vmatprep.subr.bf16.mxu0 %v379_v1 }
  0x1c   :  { %329 = vmatpush3.bf16.msra.mxu1 %v354_v14 }
  0x1d   :  { %330 = vmatprep.subr.bf16.mxu1 %v379_v1 }
  0x1e   :  { %313 = vmatpush3.bf16.msra.mxu0 %v348_v13 }
  0x20   :  { %331 = vmatpush3.bf16.msra.mxu1 %v355_v16 }
  0x21   :  { %315 = vmatmul.mubr.bf16.vlgmr.msra.gmra.mxu0 %v22_v15  ;;  %332 = vmatprep.subr.bf16.mxu1 %v379_v1 }
  0x24   :  { %333 = vmatpush3.bf16.msra.mxu1 %v356_v17 }
  0xe1   :  { %v128_v19 = vpop.f32.mrf.mxu0 }
  0xe2   :  { %v129_v20 = vadd.f32 %v262_v18, %v128_v19 }
  0xe3   :  { %v316_v21 = vpop.f32.mrf.mxu0 }
  0xe4   :  { %v134_v22 = vmax.f32 %v129_v20, 0.0 }
  0xe5   :  { %v131_v23 = vpop.f32.mrf.mxu0 }
  0xe6   :  { %v135_v24 = vpack.c.bf16 %v134_v22, %v134_v22 }
  0xe7   :  { %v317_v25 = vpop.f32.mrf.mxu0 }
  0xe8   :  { %335 = vmatmul.mubr.bf16.vlgmr.msra.gmra.mxu1 %v135_v24 }
 0x1a8   :  { %v241_v27 = vpop.f32.mrf.mxu1 }
 0x1a9   :  { %v242_v28 = vadd.f32 %v271_v26, %v241_v27 }
 0x1aa   :  { %v336_v29 = vpop.f32.mrf.mxu1 }
 0x1ab   :  { %247 = vst [vmem:[#allocation2] sm:$0xff] %v242_v28 }
 0x1ac   :  { %v244_v30 = vpop.f32.mrf.mxu1 }
 0x1ad   :  { %368 = shalt.err (!%p365_p4)
}
 0x1ae   :  { %257 = dma.vmem_to_hbm [thread:$0]  %s255_s30, 128, %s477_s5, [#allocation3]   ;;  %v337_v31 = vpop.f32.mrf.mxu1 }
 0x1af   :  { %377 = dma.done.wait [#allocation3], 128  }
 0x1b0   :  { %378 = vsyncadd [#allocation3], 4294967168 }
 0x1b1   :  { %261 = vsyncpa [#allocation3], 1 }

</bundles_post_ra>
